<compile_context>
chip_gen: v6e
topology: v6e:2x2x1
jax: 0.10.0
libtpu: 0.0.40
codegen_flags: <defaults>
</compile_context>

<pallas_src>
import jax
import jax.numpy as jnp
from jax import lax
from jax.experimental import pallas as pl
from jax.experimental.pallas import tpu as pltpu


def value_net_kernel(x_ref, w1_ref, b1_ref, w2_ref, b2_ref, o_ref):
    # fc1: (TB, S) @ (S, H) on the MXU, f32 accumulation.
    h = jnp.dot(x_ref[...], w1_ref[...], preferred_element_type=jnp.float32)
    # Bias + relu in f32 (VPU).
    h = jnp.maximum(h + b1_ref[...], 0.0)                          # (TB, H)
    # fc2: contract H of w2 (1, H) with H of h (TB, H) -> (1, TB).
    # Result has batch on the lane axis -> lane-dense, unmasked output store.
    out = lax.dot_general(
        w2_ref[...], h,
        dimension_numbers=(((1,), (1,)), ((), ())),
        preferred_element_type=jnp.float32)                        # (1, TB)
    out = out + b2_ref[0]                                          # scalar bias from SMEM
    o_ref[...] = out.astype(o_ref.dtype)


def prepare_params(w1, b1, w2, b2, matmul_dtype=None):
    """One-time layout prep (outside the hot path).

    PyTorch layouts in:  w1 (H, S), b1 (H,), w2 (1, H), b2 (1,).
    Kernel layouts out:  w1_t (S, H) in matmul dtype, b1 (1, H) f32,
                         w2 (1, H) f32, b2 (1,) f32.
    """
    mm_dtype = matmul_dtype if matmul_dtype is not None else w1.dtype
    w1_t = jnp.asarray(w1, jnp.float32).T.astype(mm_dtype)         # (S, H)
    b1_r = jnp.asarray(b1, jnp.float32).reshape(1, -1)             # (1, H)
    w2_r = jnp.asarray(w2, jnp.float32).reshape(1, -1)             # (1, H)
    b2_s = jnp.asarray(b2, jnp.float32).reshape(-1)[:1]            # (1,)
    return w1_t, b1_r, w2_r, b2_s


def value_net_forward(x, params, *, block_b=512):
    """x: (B, S) observations; params from prepare_params(). Returns (B, 1)."""
    w1_t, b1_r, w2_r, b2_s = params
    B, S = x.shape
    S_w, H = w1_t.shape
    assert S == S_w, "observation feature dim does not match fc1 weight"
    assert block_b % 128 == 0, "batch tile must be a multiple of 128"
    out_dtype = x.dtype

    # Batch tile: multiple of 128 (lane-dense output), capped at block_b.
    # Tiles are tiny relative to VMEM (sized for v7x's 64 MiB as well):
    # 2x-buffered (TB,S) x + resident (S,H) w1 + (1,TB) out.
    tb = min(block_b, max(128, pl.next_power_of_2(B)))
    num_tiles = pl.cdiv(B, tb)
    b_pad = num_tiles * tb

    x_mm = x.astype(w1_t.dtype)
    if b_pad != B:
        x_mm = jnp.pad(x_mm, ((0, b_pad - B), (0, 0)))

    out_row = pl.pallas_call(
        value_net_kernel,
        out_shape=jax.ShapeDtypeStruct((1, b_pad), out_dtype),
        grid=(num_tiles,),
        in_specs=[
            pl.BlockSpec((tb, S), lambda i: (i, 0)),               # x tile (pipelined)
            pl.BlockSpec((S, H), lambda i: (0, 0)),                # w1 resident
            pl.BlockSpec((1, H), lambda i: (0, 0)),                # b1 resident
            pl.BlockSpec((1, H), lambda i: (0, 0)),                # w2 resident
            pl.BlockSpec(memory_space=pltpu.MemorySpace.SMEM),     # b2 scalar
        ],
        out_specs=pl.BlockSpec((1, tb), lambda i: (0, i)),         # lane-dense out slab
        compiler_params=pltpu.CompilerParams(
            dimension_semantics=("parallel",)),
    )(x_mm, w1_t, b1_r, w2_r, b2_s)

    return out_row[0, :B].reshape(B, 1).astype(out_dtype)


def init_params(key, state_dim, hidden_dim, dtype=jnp.float32):
    """Deterministic init mimicking nn.Linear's U(-1/sqrt(fan_in), +1/sqrt(fan_in))."""
    k1, k2, k3, k4 = jax.random.split(key, 4)
    bound1 = 1.0 / jnp.sqrt(jnp.float32(state_dim))
    bound2 = 1.0 / jnp.sqrt(jnp.float32(hidden_dim))
    w1 = jax.random.uniform(k1, (hidden_dim, state_dim), dtype, -bound1, bound1)
    b1 = jax.random.uniform(k2, (hidden_dim,), dtype, -bound1, bound1)
    w2 = jax.random.uniform(k3, (1, hidden_dim), dtype, -bound2, bound2)
    b2 = jax.random.uniform(k4, (1,), dtype, -bound2, bound2)
    return w1, b1, w2, b2


if __name__ == "__main__":
    batch = 8
    state_dim = 16
    hidden_dim = 32

    key = jax.random.PRNGKey(0)
    k_params, k_obs = jax.random.split(key)

    w1, b1, w2, b2 = init_params(k_params, state_dim, hidden_dim)
    observation = jax.random.normal(k_obs, (batch, state_dim), dtype=jnp.float32)

    # Pure-JAX reference of the PyTorch math.
    ref = jnp.maximum(observation @ w1.T + b1, 0.0) @ w2.T + b2

    # f32 matmul path.
    params_f32 = prepare_params(w1, b1, w2, b2)
    out = jax.block_until_ready(value_net_forward(observation, params_f32))
    assert out.shape == (batch, 1)
    assert jnp.allclose(out, ref, atol=1e-4, rtol=1e-4)

    # bf16 matmul-operand path (f32 accumulation) — the v6e/v7x configuration.
    params_bf16 = prepare_params(w1, b1, w2, b2, matmul_dtype=jnp.bfloat16)
    out_bf16 = jax.block_until_ready(value_net_forward(observation, params_bf16))
    assert out_bf16.shape == (batch, 1)
    assert jnp.allclose(out_bf16, ref, atol=5e-2, rtol=5e-2)

    print("KERNEL_OK")
</pallas_src>

<mosaic_0001>
module attributes {stable_mosaic.version = 11 : i64} {
  func.func @value_net_kernel(%arg0: i32, %arg1: memref<128x16xf32, #tpu.memory_space<vmem>>, %arg2: memref<16x32xf32, #tpu.memory_space<vmem>>, %arg3: memref<1x32xf32, #tpu.memory_space<vmem>>, %arg4: memref<1x32xf32, #tpu.memory_space<vmem>>, %arg5: memref<1xf32, #tpu.memory_space<smem>>, %arg6: memref<1x128xf32, #tpu.memory_space<vmem>>) attributes {dimension_semantics = [#tpu.dimension_semantics<parallel>], iteration_bounds = array<i64: 1>, scalar_prefetch = 0 : i64, scratch_operands = 0 : i64, tpu.core_type = #tpu.core_type<tc>, window_params = [{transform_indices = @transform_0, window_bounds = array<i64: 128, 16>}, {pipeline_mode = #tpu.pipeline_mode<synchronous>, transform_indices = @transform_1, window_bounds = array<i64: 16, 32>}, {pipeline_mode = #tpu.pipeline_mode<synchronous>, transform_indices = @transform_2, window_bounds = array<i64: 1, 32>}, {pipeline_mode = #tpu.pipeline_mode<synchronous>, transform_indices = @transform_3, window_bounds = array<i64: 1, 32>}, {transform_indices = @transform_4, window_bounds = array<i64: 1>}, {transform_indices = @transform_5, window_bounds = array<i64: 1, 128>}]} {
    %c0 = arith.constant 0 : index
    %c0_0 = arith.constant 0 : index
    %0 = vector.load %arg1[%c0, %c0_0] : memref<128x16xf32, #tpu.memory_space<vmem>>, vector<128x16xf32>
    %c0_1 = arith.constant 0 : index
    %c0_2 = arith.constant 0 : index
    %1 = vector.load %arg2[%c0_1, %c0_2] : memref<16x32xf32, #tpu.memory_space<vmem>>, vector<16x32xf32>
    %cst = arith.constant dense<0.000000e+00> : vector<128x32xf32>
    %2 = tpu.matmul %0, %1, %cst {dimension_numbers = #tpu.dot_dimension_numbers<[1], [0], [0], [1], [0, 0, 1, 1], [], []>} : vector<128x16xf32>, vector<16x32xf32>, vector<128x32xf32> -> vector<128x32xf32>
    %c0_3 = arith.constant 0 : index
    %c0_4 = arith.constant 0 : index
    %3 = vector.load %arg3[%c0_3, %c0_4] : memref<1x32xf32, #tpu.memory_space<vmem>>, vector<1x32xf32>
    %4 = vector.broadcast %3 : vector<1x32xf32> to vector<128x32xf32>
    %5 = arith.addf %2, %4 : vector<128x32xf32>
    %cst_5 = arith.constant 0.000000e+00 : f32
    %6 = vector.broadcast %cst_5 : f32 to vector<128x32xf32>
    %7 = arith.maximumf %5, %6 : vector<128x32xf32>
    %c0_6 = arith.constant 0 : index
    %c0_7 = arith.constant 0 : index
    %8 = vector.load %arg4[%c0_6, %c0_7] : memref<1x32xf32, #tpu.memory_space<vmem>>, vector<1x32xf32>
    %cst_8 = arith.constant dense<0.000000e+00> : vector<1x128xf32>
    %9 = tpu.matmul %8, %7, %cst_8 {dimension_numbers = #tpu.dot_dimension_numbers<[1], [1], [0], [0], [0, 0, 1, 0], [], []>} : vector<1x32xf32>, vector<128x32xf32>, vector<1x128xf32> -> vector<1x128xf32>
    %c0_9 = arith.constant 0 : index
    %10 = memref.load %arg5[%c0_9] : memref<1xf32, #tpu.memory_space<smem>>
    %11 = vector.broadcast %10 : f32 to vector<1x128xf32>
    %12 = arith.addf %9, %11 : vector<1x128xf32>
    %c0_10 = arith.constant 0 : index
    %c0_11 = arith.constant 0 : index
    %13 = vector.load %arg6[%c0_10, %c0_11] : memref<1x128xf32, #tpu.memory_space<vmem>>, vector<1x128xf32>
    tpu.vector_store %arg6[%c0_10, %c0_11], %12 {strides = array<i32>} : memref<1x128xf32, #tpu.memory_space<vmem>>, vector<1x128xf32>,
    return
  }
  func.func @transform_0(%arg0: i32) -> (i32, i32) {
    %c0_i32 = arith.constant 0 : i32
    %c0_i32_0 = arith.constant 0 : i32
    return %arg0, %c0_i32 : i32, i32
  }
  func.func @transform_1(%arg0: i32) -> (i32, i32) {
    %c0_i32 = arith.constant 0 : i32
    %c0_i32_0 = arith.constant 0 : i32
    %c0_i32_1 = arith.constant 0 : i32
    return %c0_i32, %c0_i32_0 : i32, i32
  }
  func.func @transform_2(%arg0: i32) -> (i32, i32) {
    %c0_i32 = arith.constant 0 : i32
    %c0_i32_0 = arith.constant 0 : i32
    %c0_i32_1 = arith.constant 0 : i32
    return %c0_i32, %c0_i32_0 : i32, i32
  }
  func.func @transform_3(%arg0: i32) -> (i32, i32) {
    %c0_i32 = arith.constant 0 : i32
    %c0_i32_0 = arith.constant 0 : i32
    %c0_i32_1 = arith.constant 0 : i32
    return %c0_i32, %c0_i32_0 : i32, i32
  }
  func.func @transform_4(%arg0: i32) -> i32 {
    %c0_i32 = arith.constant 0 : i32
    %c0_i32_0 = arith.constant 0 : i32
    return %c0_i32 : i32
  }
  func.func @transform_5(%arg0: i32) -> (i32, i32) {
    %c0_i32 = arith.constant 0 : i32
    %c0_i32_0 = arith.constant 0 : i32
    return %c0_i32, %arg0 : i32, i32
  }
}

</mosaic_0001>

<bundles_post_ra>
// kernel: tpu_custom_call.1
= control target key start
LH: loop header
LB: loop body
LE: loop exit
PB: predicated region body
PF: predicated region fallthrough
CT: control target
= control target key end

     0   :  { %vm47_vm0 = vcmask 130048   ;;  %s712_s0 = inlined_call_operand.vmem [shape: f32[128,16], index: 0, kind: input, shape index: {}]   ;;  %s713_s1 = inlined_call_operand.vmem [shape: f32[16,32], index: 1, kind: input, shape index: {}]   ;;  %s714_s2 = inlined_call_operand.vmem [shape: f32[1,32], index: 2, kind: input, shape index: {}]   ;;  %s715_s3 = inlined_call_operand.vmem [shape: f32[1,32], index: 3, kind: input, shape index: {}]   ;;  %s716_s4 = inlined_call_operand.<no memory space> [shape: f32[1], index: 4, kind: input, shape index: {}]   ;;  %s717_s5 = inlined_call_operand.hbm [shape: f32[1,128], index: 5, kind: output, shape index: {}]  }
   0x1   :  { %v39_v0 = vld [vmem:[%s713_s1 + $0x8] sm:$0xff]  ;;  %v38_v1 = vld [vmem:[%s713_s1] sm:$0xff]  ;;  %v24_v4 = vld [vmem:[%s712_s0 + $0x10] sm:$0xff] }
   0x2   :  { %v22_v2 = vld [vmem:[%s712_s0] sm:$0xff]  ;;  %466 = vmatprep.subr.mxu0 %v39_v0  ;;  %v23_v3 = vld [vmem:[%s712_s0 + $0x8] sm:$0xff]  ;;  %v25_v5 = vld [vmem:[%s712_s0 + $0x18] sm:$0xff] }
   0x3   :  { %470 = vmatprep.mubr.msk.f32.mxu0 %vm47_vm0, %v22_v2  ;;  %467 = vmatpush3.msra.mxu0 %v39_v0 }
   0x4   :  { %468 = vmatprep.subr.mxu0 %v38_v1 }
   0x5   :  { %469 = vmatpush3.msra.mxu0 %v38_v1 }
   0x6   :  { %471 = vmatmul.mubr.msk.f32.vlgmr.msra.gmra.mxu0 %vm47_vm0, %v23_v3 }
   0x7   :  { %473 = vmatprep.mubr.msk.f32.mxu0 %vm47_vm0, %v24_v4 }
   0x8   :  { %11 = vsyncpa [#allocation4], 0  ;;  %v26_v6 = vld [vmem:[%s712_s0 + $0x20] sm:$0xff]  ;;  %v27_v7 = vld [vmem:[%s712_s0 + $0x28] sm:$0xff]  ;;  %v554_v18 = vmov 0.0   ;;  %vm555_vm1 = vmmov 0  }
   0x9   :  { %v28_v8 = vld [vmem:[%s712_s0 + $0x30] sm:$0xff]  ;;  %v29_v9 = vld [vmem:[%s712_s0 + $0x38] sm:$0xff]  ;;  %v30_v10 = vld [vmem:[%s712_s0 + $0x40] sm:$0xff]  ;;  %494 = vmatprep.subr.mxu1 %v554_v18  ;;  %526 = vmatprep.mubr.msk.f32.mxu1 %vm555_vm1, %v554_v18  ;;  %vm260_vm2 = vcmask 261120   ;;  %s556_s6 = smov [#allocation3]  }
   0xa   :  { %474 = vmatmul.mubr.msk.f32.gmra.mxu0 %vm47_vm0, %v25_v5  ;;  %v31_v11 = vld [vmem:[%s712_s0 + $0x48] sm:$0xff]  ;;  %v32_v12 = vld [vmem:[%s712_s0 + $0x50] sm:$0xff]  ;;  %v33_v13 = vld [vmem:[%s712_s0 + $0x58] sm:$0xff]  ;;  %v259_v5 = vstv %s716_s4  ;;  %s389_s7 = sshll.u32 %s556_s6, 4  ;;  %s390_s7 = int_to_ptr.vmem [resolvable:$true] %s389_s7 }
   0xb   :  { %476 = vmatprep.mubr.msk.f32.mxu0 %vm47_vm0, %v26_v6  ;;  %v34_v14 = vld [vmem:[%s712_s0 + $0x60] sm:$0xff]  ;;  %v35_v15 = vld [vmem:[%s712_s0 + $0x68] sm:$0xff]  ;;  %v36_v16 = vld [vmem:[%s712_s0 + $0x70] sm:$0xff]  ;;  %s532_s8 = scalar_lea.vmem %s390_s7, 16  ;;  %s536_s9 = scalar_lea.vmem %s390_s7, 32 }
   0xc   :  { %v37_v17 = vld [vmem:[%s712_s0 + $0x78] sm:$0xff]  ;;  %v397_v33 = vld [vmem:[%s714_s2] ss:$0 sm:$0xff]  ;;  %p533_p0 = scmp.ne.s32.totalorder %s390_s7, %s532_s8  ;;  %p537_p1 = scmp.lt.s32.totalorder %s390_s7, %s390_s7 }
   0xd   :  { %v257_v4 = vld [vmem:[%s715_s3] sm:$0x1]  ;;  %p538_p2 = scmp.lt.s32.totalorder %s536_s9, %s532_s8 }
   0xe   :  { %477 = vmatmul.mubr.msk.f32.gmra.mxu0 %vm47_vm0, %v27_v7 }
   0xf   :  { %479 = vmatprep.mubr.msk.f32.mxu0 %vm47_vm0, %v28_v8  ;;  %p539_p3 = por %p538_p2, %p537_p1 }
  0x11   :  { %p540_p4 = pnand %p539_p3, %p533_p0 }
  0x12   :  { %480 = vmatmul.mubr.msk.f32.gmra.mxu0 %vm47_vm0, %v29_v9 }
  0x13   :  { %482 = vmatprep.mubr.msk.f32.mxu0 %vm47_vm0, %v30_v10 }
  0x16   :  { %483 = vmatmul.mubr.msk.f32.gmra.mxu0 %vm47_vm0, %v31_v11 }
  0x17   :  { %485 = vmatprep.mubr.msk.f32.mxu0 %vm47_vm0, %v32_v12 }
  0x1a   :  { %486 = vmatmul.mubr.msk.f32.gmra.mxu0 %vm47_vm0, %v33_v13 }
  0x1b   :  { %488 = vmatprep.mubr.msk.f32.mxu0 %vm47_vm0, %v34_v14 }
  0x1e   :  { %489 = vmatmul.mubr.msk.f32.gmra.mxu0 %vm47_vm0, %v35_v15 }
  0x1f   :  { %491 = vmatprep.mubr.msk.f32.mxu0 %vm47_vm0, %v36_v16 }
  0x22   :  { %492 = vmatmul.mubr.msk.f32.gmra.mxu0 %vm47_vm0, %v37_v17 }
  0xc6   :  { %v659_v19 = vpop.f32.mrf.mxu0 }
  0xc7   :  { %v168_v63 = vadd.f32 %v659_v19, %v397_v33 }
  0xc8   :  { %v661_v20 = vpop.f32.mrf.mxu0 }
  0xc9   :  { %v242_v1 = vmax.f32 %v168_v63, 0.0  ;;  %v163_v2 = vadd.f32 %v397_v33, %v661_v20 }
  0xca   :  { %v475_v21 = vpop.f32.mrf.mxu0 }
  0xcb   :  { %v178_v59 = vadd.f32 %v475_v21, %v397_v33  ;;  %v241_v3 = vmax.f32 %v163_v2, 0.0 }
  0xcc   :  { %v663_v22 = vpop.f32.mrf.mxu0 }
  0xcd   :  { %v244_v61 = vmax.f32 %v178_v59, 0.0  ;;  %v173_v62 = vadd.f32 %v397_v33, %v663_v22 }
  0xce   :  { %v478_v23 = vpop.f32.mrf.mxu0 }
  0xcf   :  { %v188_v55 = vadd.f32 %v478_v23, %v397_v33  ;;  %v243_v0 = vmax.f32 %v173_v62, 0.0 }
  0xd0   :  { %v182_v24 = vpop.f32.mrf.mxu0 }
  0xd1   :  { %v246_v57 = vmax.f32 %v188_v55, 0.0  ;;  %v183_v58 = vadd.f32 %v397_v33, %v182_v24 }
  0xd2   :  { %v481_v25 = vpop.f32.mrf.mxu0 }
  0xd3   :  { %v198_v51 = vadd.f32 %v481_v25, %v397_v33  ;;  %v245_v60 = vmax.f32 %v183_v58, 0.0 }
  0xd4   :  { %v192_v26 = vpop.f32.mrf.mxu0 }
  0xd5   :  { %v248_v53 = vmax.f32 %v198_v51, 0.0  ;;  %v193_v54 = vadd.f32 %v397_v33, %v192_v26 }
  0xd6   :  { %v484_v27 = vpop.f32.mrf.mxu0 }
  0xd7   :  { %v208_v47 = vadd.f32 %v484_v27, %v397_v33  ;;  %v247_v56 = vmax.f32 %v193_v54, 0.0 }
  0xd8   :  { %v202_v28 = vpop.f32.mrf.mxu0 }
  0xd9   :  { %v250_v49 = vmax.f32 %v208_v47, 0.0  ;;  %v203_v50 = vadd.f32 %v397_v33, %v202_v28 }
  0xda   :  { %v487_v29 = vpop.f32.mrf.mxu0 }
  0xdb   :  { %v218_v43 = vadd.f32 %v487_v29, %v397_v33  ;;  %v249_v52 = vmax.f32 %v203_v50, 0.0 }
  0xdc   :  { %v212_v30 = vpop.f32.mrf.mxu0 }
  0xdd   :  { %v252_v45 = vmax.f32 %v218_v43, 0.0  ;;  %v213_v46 = vadd.f32 %v397_v33, %v212_v30 }
  0xde   :  { %v490_v31 = vpop.f32.mrf.mxu0 }
  0xdf   :  { %v228_v39 = vadd.f32 %v490_v31, %v397_v33  ;;  %v251_v48 = vmax.f32 %v213_v46, 0.0 }
  0xe0   :  { %v222_v32 = vpop.f32.mrf.mxu0 }
  0xe1   :  { %v254_v41 = vmax.f32 %v228_v39, 0.0  ;;  %v223_v42 = vadd.f32 %v397_v33, %v222_v32 }
  0xe2   :  { %v493_v34 = vpop.f32.mrf.mxu0 }
  0xe3   :  { %v238_v35 = vadd.f32 %v493_v34, %v397_v33  ;;  %v253_v44 = vmax.f32 %v223_v42, 0.0 }
  0xe4   :  { %v232_v36 = vpop.f32.mrf.mxu0 }
  0xe5   :  { %v256_v37 = vmax.f32 %v238_v35, 0.0  ;;  %v233_v38 = vadd.f32 %v397_v33, %v232_v36 }
  0xe7   :  { %495 = vmatpush3.xpose.msk.msra.mxu1 %vm260_vm2, %v256_v37  ;;  %v255_v40 = vmax.f32 %v233_v38, 0.0 }
  0xe8   :  { %496 = vmatprep.subr.mxu1 %v554_v18 }
  0xeb   :  { %497 = vmatpush3.xpose.msk.msra.mxu1 %vm260_vm2, %v255_v40 }
  0xec   :  { %498 = vmatprep.subr.mxu1 %v554_v18 }
  0xef   :  { %499 = vmatpush3.xpose.msk.msra.mxu1 %vm260_vm2, %v254_v41 }
  0xf0   :  { %500 = vmatprep.subr.mxu1 %v554_v18 }
  0xf3   :  { %501 = vmatpush3.xpose.msk.msra.mxu1 %vm260_vm2, %v253_v44 }
  0xf4   :  { %502 = vmatprep.subr.mxu1 %v554_v18 }
  0xf7   :  { %503 = vmatpush3.xpose.msk.msra.mxu1 %vm260_vm2, %v252_v45 }
  0xf8   :  { %504 = vmatprep.subr.mxu1 %v554_v18 }
  0xfb   :  { %505 = vmatpush3.xpose.msk.msra.mxu1 %vm260_vm2, %v251_v48 }
  0xfc   :  { %506 = vmatprep.subr.mxu1 %v554_v18 }
  0xff   :  { %507 = vmatpush3.xpose.msk.msra.mxu1 %vm260_vm2, %v250_v49 }
 0x100   :  { %508 = vmatprep.subr.mxu1 %v554_v18 }
 0x103   :  { %509 = vmatpush3.xpose.msk.msra.mxu1 %vm260_vm2, %v249_v52 }
 0x104   :  { %510 = vmatprep.subr.mxu1 %v554_v18 }
 0x107   :  { %511 = vmatpush3.xpose.msk.msra.mxu1 %vm260_vm2, %v248_v53 }
 0x108   :  { %512 = vmatprep.subr.mxu1 %v554_v18 }
 0x10b   :  { %513 = vmatpush3.xpose.msk.msra.mxu1 %vm260_vm2, %v247_v56 }
 0x10c   :  { %514 = vmatprep.subr.mxu1 %v554_v18 }
 0x10f   :  { %515 = vmatpush3.xpose.msk.msra.mxu1 %vm260_vm2, %v246_v57 }
 0x110   :  { %516 = vmatprep.subr.mxu1 %v554_v18 }
 0x113   :  { %517 = vmatpush3.xpose.msk.msra.mxu1 %vm260_vm2, %v245_v60 }
 0x114   :  { %518 = vmatprep.subr.mxu1 %v554_v18 }
 0x117   :  { %519 = vmatpush3.xpose.msk.msra.mxu1 %vm260_vm2, %v244_v61 }
 0x118   :  { %520 = vmatprep.subr.mxu1 %v554_v18 }
 0x11b   :  { %521 = vmatpush3.xpose.msk.msra.mxu1 %vm260_vm2, %v243_v0 }
 0x11c   :  { %522 = vmatprep.subr.mxu1 %v554_v18 }
 0x11f   :  { %523 = vmatpush3.xpose.msk.msra.mxu1 %vm260_vm2, %v242_v1 }
 0x120   :  { %524 = vmatprep.subr.mxu1 %v554_v18 }
 0x123   :  { %525 = vmatpush3.xpose.msk.msra.mxu1 %vm260_vm2, %v241_v3 }
 0x126   :  { %527 = vmatmul.mubr.msk.f32.vlgmr.msra.gmra.mxu1 %vm260_vm2, %v257_v4 }
 0x1e6   :  { %v378_v6 = vpop.f32.mrf.mxu1 }
 0x1e7   :  { %v379_v7 = vadd.f32 %v378_v6, %v259_v5 }
 0x1e8   :  { %v528_v8 = vpop.f32.mrf.mxu1 }
 0x1e9   :  { %382 = vst [vmem:[#allocation3] sm:$0x1] %v379_v7 }
 0x1ea   :  { %543 = shalt.err (!%p540_p4)
}
 0x1eb   :  { %392 = dma.vmem_to_hbm [thread:$0]  %s390_s7, 16, %s717_s5, [#allocation4]  }
 0x1ec   :  { %552 = dma.done.wait [#allocation4], 16  }
 0x1ed   :  { %553 = vsyncadd [#allocation4], 4294967280 }
 0x1ee   :  { %396 = vsyncpa [#allocation4], 1 }

</bundles_post_ra>
